<compile_context>
chip_gen: v5e
topology: v5e:2x2
jax: 0.10.0
libtpu: 0.0.40
codegen_flags: <defaults>
</compile_context>

<pallas_src>
import functools

import jax
import jax.numpy as jnp
from jax.experimental import pallas as pl
from jax.experimental.pallas import tpu as pltpu


def _round_up(x: int, m: int) -> int:
    return ((x + m - 1) // m) * m


def decoder_kernel(z_ref, w1_ref, b1_ref, w2_ref, b2_ref, w3_ref, b3_ref, out_ref):
    # Cast the f32 z tile to the matmul dtype in VMEM (no extra HBM pass).
    z = z_ref[...].astype(w1_ref.dtype)
    # fc1 + ReLU  (bf16 operands, f32 accumulation; bias/ReLU in f32)
    h1 = jnp.dot(z, w1_ref[...], preferred_element_type=jnp.float32)
    h1 = jnp.maximum(h1 + b1_ref[...], 0.0)
    # fc2 + ReLU
    h2 = jnp.dot(h1.astype(w2_ref.dtype), w2_ref[...], preferred_element_type=jnp.float32)
    h2 = jnp.maximum(h2 + b2_ref[...], 0.0)
    # fc3 (no activation)
    out = jnp.dot(h2.astype(w3_ref.dtype), w3_ref[...], preferred_element_type=jnp.float32)
    out_ref[...] = (out + b3_ref[...]).astype(out_ref.dtype)


def prepare_decoder_params(params, matmul_dtype=jnp.bfloat16):
    """Zero-pad only the *output* dims of each layer to multiples of 128 and cast
    weights to the MXU dtype.  The fc1 contraction dim keeps exactly hid_dim rows
    (z is read unpadded), and zero-padded output columns / biases keep the math
    exact on the live output slice.  Biases stay f32."""
    w1, b1, w2, b2, w3, b3 = params
    hid_dim, d1 = w1.shape
    d2 = w2.shape[1]
    param_dim = w3.shape[1]
    d1_p, d2_p, param_p = (_round_up(d, 128) for d in (d1, d2, param_dim))

    def pad2(a, r, c):
        return jnp.pad(a, ((0, r - a.shape[0]), (0, c - a.shape[1])))

    padded = (
        pad2(w1, hid_dim, d1_p).astype(matmul_dtype),   # [hid_dim, d1_p] (rows unpadded)
        pad2(b1, 1, d1_p).astype(jnp.float32),
        pad2(w2, d1_p, d2_p).astype(matmul_dtype),
        pad2(b2, 1, d2_p).astype(jnp.float32),
        pad2(w3, d2_p, param_p).astype(matmul_dtype),
        pad2(b3, 1, param_p).astype(jnp.float32),
    )
    return padded, (hid_dim, param_dim)


@functools.partial(jax.jit, static_argnames=("param_dim", "block_b", "out_dtype"))
def decoder_forward(z, padded_params, param_dim, *, block_b=512, out_dtype=jnp.float32):
    """z: [B, hid_dim] (f32) -> [B, param_dim].  Whole MLP fused in one pipelined
    Pallas kernel.  `out_dtype=jnp.bfloat16` halves output HBM traffic if the
    consumer tolerates bf16."""
    w1, b1, w2, b2, w3, b3 = padded_params
    B, hid_dim = z.shape
    assert hid_dim == w1.shape[0], "z feature dim must match fc1 in_features"
    param_p = w3.shape[1]

    # --- Batch tiling ----------------------------------------------------------
    # * tiles are multiples of 16 rows (bf16 sublane packing),
    # * balanced across the grid (no mostly-empty last tile),
    # * >= 2 tiles whenever B > 16 so v7x's two TensorCores both get work,
    # * capped at block_b rows to stay comfortably in VMEM.
    num_tiles = max(pl.cdiv(B, block_b), 2 if B > 16 else 1)
    TB = _round_up(pl.cdiv(B, num_tiles), 16)
    num_tiles = pl.cdiv(B, TB)            # drop any fully-padded tail tiles
    B_pad = num_tiles * TB

    z_in = z if B_pad == B else jnp.pad(z, ((0, B_pad - B), (0, 0)))

    resident = lambda a: pl.BlockSpec(a.shape, lambda i: (0,) * a.ndim)  # stays in VMEM

    out = pl.pallas_call(
        decoder_kernel,
        out_shape=jax.ShapeDtypeStruct((B_pad, param_p), out_dtype),
        grid=(num_tiles,),
        in_specs=[
            # z tile: last dim == full array dim (hid_dim may be < 128) -> legal,
            # and reads only the live hid_dim columns (no padded-z traffic).
            pl.BlockSpec((TB, hid_dim), lambda i: (i, 0)),
            resident(w1), resident(b1),
            resident(w2), resident(b2),
            resident(w3), resident(b3),
        ],
        out_specs=pl.BlockSpec((TB, param_p), lambda i: (i, 0)),
        compiler_params=pltpu.CompilerParams(
            dimension_semantics=("parallel",),  # v7x: shard batch tiles across both TCs
        ),
    )(z_in, w1, b1, w2, b2, w3, b3)

    # Avoid an extra HBM pass when no padding was added.
    if B_pad == B and param_p == param_dim:
        return out
    return out[:B, :param_dim]


def init_decoder_params(key, hid_dim, param_dim):
    """Deterministic init mirroring the shapes of the PyTorch Decoder (f32 master params)."""
    mid_rate = (param_dim / hid_dim) ** (1.0 / 3.0)
    d1 = round(hid_dim * mid_rate)
    d2 = round(hid_dim * mid_rate ** 2)

    ks = jax.random.split(key, 6)

    def linear(kw, kb, fan_in, fan_out):
        # torch.nn.Linear default-ish: U(-1/sqrt(fan_in), 1/sqrt(fan_in))
        bound = 1.0 / jnp.sqrt(fan_in)
        w = jax.random.uniform(kw, (fan_in, fan_out), jnp.float32, -bound, bound)
        b = jax.random.uniform(kb, (1, fan_out), jnp.float32, -bound, bound)
        return w, b

    w1, b1 = linear(ks[0], ks[1], hid_dim, d1)
    w2, b2 = linear(ks[2], ks[3], d1, d2)
    w3, b3 = linear(ks[4], ks[5], d2, param_dim)
    return (w1, b1, w2, b2, w3, b3)


def decoder_reference(z, params):
    """Pure-JAX f32 reference matching the PyTorch forward."""
    w1, b1, w2, b2, w3, b3 = params
    h1 = jnp.maximum(z @ w1 + b1, 0.0)
    h2 = jnp.maximum(h1 @ w2 + b2, 0.0)
    return h2 @ w3 + b3


if __name__ == "__main__":
    hid_dim = 32
    param_dim = 256   # mid_rate = (256/32)^(1/3) = 2 -> layer dims 32 -> 64 -> 128 -> 256

    key = jax.random.PRNGKey(0)
    kz, kp = jax.random.split(key)
    params = init_decoder_params(kp, hid_dim, param_dim)
    padded_params, (_, pdim) = prepare_decoder_params(params, matmul_dtype=jnp.bfloat16)

    # Case 1: tiny batch (matches the module's "b maybe 1" usage), f32 output.
    z_small = jax.random.normal(kz, (2, hid_dim), dtype=jnp.float32)
    out_small = jax.block_until_ready(decoder_forward(z_small, padded_params, param_dim=pdim))
    ref_small = decoder_reference(z_small, params)
    assert out_small.shape == (2, param_dim), out_small.shape
    assert out_small.dtype == jnp.float32
    # bf16 matmul operands (f32 accumulation) -> looser tolerance than pure f32.
    assert jnp.allclose(out_small, ref_small, atol=3e-2, rtol=3e-2), "mismatch vs reference (B=2)"

    # Case 2: batch that exercises multi-tile padding + the bf16-output fast path.
    z_med = jax.random.normal(jax.random.fold_in(kz, 1), (37, hid_dim), dtype=jnp.float32)
    out_med = jax.block_until_ready(
        decoder_forward(z_med, padded_params, param_dim=pdim, out_dtype=jnp.bfloat16)
    )
    ref_med = decoder_reference(z_med, params)
    assert out_med.shape == (37, param_dim), out_med.shape
    assert out_med.dtype == jnp.bfloat16
    assert jnp.allclose(out_med.astype(jnp.float32), ref_med, atol=5e-2, rtol=5e-2), \
        "mismatch vs reference (B=37, bf16 out)"

    print("KERNEL_OK")
</pallas_src>

<mosaic_0001>
module attributes {stable_mosaic.version = 11 : i64} {
  func.func @decoder_kernel(%arg0: i32, %arg1: memref<16x32xf32, #tpu.memory_space<vmem>>, %arg2: memref<32x128xbf16, #tpu.memory_space<vmem>>, %arg3: memref<1x128xf32, #tpu.memory_space<vmem>>, %arg4: memref<128x128xbf16, #tpu.memory_space<vmem>>, %arg5: memref<1x128xf32, #tpu.memory_space<vmem>>, %arg6: memref<128x256xbf16, #tpu.memory_space<vmem>>, %arg7: memref<1x256xf32, #tpu.memory_space<vmem>>, %arg8: memref<16x256xf32, #tpu.memory_space<vmem>>) attributes {dimension_semantics = [#tpu.dimension_semantics<parallel>], iteration_bounds = array<i64: 1>, scalar_prefetch = 0 : i64, scratch_operands = 0 : i64, tpu.core_type = #tpu.core_type<tc>, window_params = [{transform_indices = @transform_0, window_bounds = array<i64: 16, 32>}, {pipeline_mode = #tpu.pipeline_mode<synchronous>, transform_indices = @transform_1, window_bounds = array<i64: 32, 128>}, {pipeline_mode = #tpu.pipeline_mode<synchronous>, transform_indices = @transform_2, window_bounds = array<i64: 1, 128>}, {pipeline_mode = #tpu.pipeline_mode<synchronous>, transform_indices = @transform_3, window_bounds = array<i64: 128, 128>}, {pipeline_mode = #tpu.pipeline_mode<synchronous>, transform_indices = @transform_4, window_bounds = array<i64: 1, 128>}, {pipeline_mode = #tpu.pipeline_mode<synchronous>, transform_indices = @transform_5, window_bounds = array<i64: 128, 256>}, {pipeline_mode = #tpu.pipeline_mode<synchronous>, transform_indices = @transform_6, window_bounds = array<i64: 1, 256>}, {transform_indices = @transform_7, window_bounds = array<i64: 16, 256>}]} {
    %c0 = arith.constant 0 : index
    %c0_0 = arith.constant 0 : index
    %0 = vector.load %arg1[%c0, %c0_0] : memref<16x32xf32, #tpu.memory_space<vmem>>, vector<16x32xf32>
    %1 = arith.truncf %0 : vector<16x32xf32> to vector<16x32xbf16>
    %c0_1 = arith.constant 0 : index
    %c0_2 = arith.constant 0 : index
    %2 = vector.load %arg2[%c0_1, %c0_2] : memref<32x128xbf16, #tpu.memory_space<vmem>>, vector<32x128xbf16>
    %cst = arith.constant dense<0.000000e+00> : vector<16x128xf32>
    %3 = tpu.matmul %1, %2, %cst {dimension_numbers = #tpu.dot_dimension_numbers<[1], [0], [0], [1], [0, 0, 1, 1], [], []>} : vector<16x32xbf16>, vector<32x128xbf16>, vector<16x128xf32> -> vector<16x128xf32>
    %c0_3 = arith.constant 0 : index
    %c0_4 = arith.constant 0 : index
    %4 = vector.load %arg3[%c0_3, %c0_4] : memref<1x128xf32, #tpu.memory_space<vmem>>, vector<1x128xf32>
    %5 = vector.broadcast %4 : vector<1x128xf32> to vector<16x128xf32>
    %6 = arith.addf %3, %5 : vector<16x128xf32>
    %cst_5 = arith.constant 0.000000e+00 : f32
    %7 = vector.broadcast %cst_5 : f32 to vector<16x128xf32>
    %8 = arith.maximumf %6, %7 : vector<16x128xf32>
    %9 = arith.truncf %8 : vector<16x128xf32> to vector<16x128xbf16>
    %c0_6 = arith.constant 0 : index
    %c0_7 = arith.constant 0 : index
    %10 = vector.load %arg4[%c0_6, %c0_7] : memref<128x128xbf16, #tpu.memory_space<vmem>>, vector<128x128xbf16>
    %cst_8 = arith.constant dense<0.000000e+00> : vector<16x128xf32>
    %11 = tpu.matmul %9, %10, %cst_8 {dimension_numbers = #tpu.dot_dimension_numbers<[1], [0], [0], [1], [0, 0, 1, 1], [], []>} : vector<16x128xbf16>, vector<128x128xbf16>, vector<16x128xf32> -> vector<16x128xf32>
    %c0_9 = arith.constant 0 : index
    %c0_10 = arith.constant 0 : index
    %12 = vector.load %arg5[%c0_9, %c0_10] : memref<1x128xf32, #tpu.memory_space<vmem>>, vector<1x128xf32>
    %13 = vector.broadcast %12 : vector<1x128xf32> to vector<16x128xf32>
    %14 = arith.addf %11, %13 : vector<16x128xf32>
    %cst_11 = arith.constant 0.000000e+00 : f32
    %15 = vector.broadcast %cst_11 : f32 to vector<16x128xf32>
    %16 = arith.maximumf %14, %15 : vector<16x128xf32>
    %17 = arith.truncf %16 : vector<16x128xf32> to vector<16x128xbf16>
    %c0_12 = arith.constant 0 : index
    %c0_13 = arith.constant 0 : index
    %18 = vector.load %arg6[%c0_12, %c0_13] : memref<128x256xbf16, #tpu.memory_space<vmem>>, vector<128x256xbf16>
    %cst_14 = arith.constant dense<0.000000e+00> : vector<16x256xf32>
    %19 = tpu.matmul %17, %18, %cst_14 {dimension_numbers = #tpu.dot_dimension_numbers<[1], [0], [0], [1], [0, 0, 1, 1], [], []>} : vector<16x128xbf16>, vector<128x256xbf16>, vector<16x256xf32> -> vector<16x256xf32>
    %c0_15 = arith.constant 0 : index
    %c0_16 = arith.constant 0 : index
    %20 = vector.load %arg7[%c0_15, %c0_16] : memref<1x256xf32, #tpu.memory_space<vmem>>, vector<1x256xf32>
    %21 = vector.broadcast %20 : vector<1x256xf32> to vector<16x256xf32>
    %22 = arith.addf %19, %21 : vector<16x256xf32>
    %c0_17 = arith.constant 0 : index
    %c0_18 = arith.constant 0 : index
    %23 = vector.load %arg8[%c0_17, %c0_18] : memref<16x256xf32, #tpu.memory_space<vmem>>, vector<16x256xf32>
    tpu.vector_store %arg8[%c0_17, %c0_18], %22 {strides = array<i32>} : memref<16x256xf32, #tpu.memory_space<vmem>>, vector<16x256xf32>,
    return
  }
  func.func @transform_0(%arg0: i32) -> (i32, i32) {
    %c0_i32 = arith.constant 0 : i32
    %c0_i32_0 = arith.constant 0 : i32
    return %arg0, %c0_i32 : i32, i32
  }
  func.func @transform_1(%arg0: i32) -> (i32, i32) {
    %c0_i32 = arith.constant 0 : i32
    %c0_i32_0 = arith.constant 0 : i32
    %c0_i32_1 = arith.constant 0 : i32
    return %c0_i32, %c0_i32_0 : i32, i32
  }
  func.func @transform_2(%arg0: i32) -> (i32, i32) {
    %c0_i32 = arith.constant 0 : i32
    %c0_i32_0 = arith.constant 0 : i32
    %c0_i32_1 = arith.constant 0 : i32
    return %c0_i32, %c0_i32_0 : i32, i32
  }
  func.func @transform_3(%arg0: i32) -> (i32, i32) {
    %c0_i32 = arith.constant 0 : i32
    %c0_i32_0 = arith.constant 0 : i32
    %c0_i32_1 = arith.constant 0 : i32
    return %c0_i32, %c0_i32_0 : i32, i32
  }
  func.func @transform_4(%arg0: i32) -> (i32, i32) {
    %c0_i32 = arith.constant 0 : i32
    %c0_i32_0 = arith.constant 0 : i32
    %c0_i32_1 = arith.constant 0 : i32
    return %c0_i32, %c0_i32_0 : i32, i32
  }
  func.func @transform_5(%arg0: i32) -> (i32, i32) {
    %c0_i32 = arith.constant 0 : i32
    %c0_i32_0 = arith.constant 0 : i32
    %c0_i32_1 = arith.constant 0 : i32
    return %c0_i32, %c0_i32_0 : i32, i32
  }
  func.func @transform_6(%arg0: i32) -> (i32, i32) {
    %c0_i32 = arith.constant 0 : i32
    %c0_i32_0 = arith.constant 0 : i32
    %c0_i32_1 = arith.constant 0 : i32
    return %c0_i32, %c0_i32_0 : i32, i32
  }
  func.func @transform_7(%arg0: i32) -> (i32, i32) {
    %c0_i32 = arith.constant 0 : i32
    %c0_i32_0 = arith.constant 0 : i32
    return %arg0, %c0_i32 : i32, i32
  }
}

</mosaic_0001>

<bundles_post_ra>
// kernel: decoder_forward.1
= control target key start
LH: loop header
LB: loop body
LE: loop exit
PB: predicated region body
PF: predicated region fallthrough
CT: control target
= control target key end

     0   :  { %12 = vsyncpa [#allocation3], 0  ;;  %s604_s0 = inlined_call_operand.vmem [shape: f32[16,32], index: 0, kind: input, shape index: {}]   ;;  %s605_s1 = inlined_call_operand.vmem [shape: bf16[32,128], index: 1, kind: input, shape index: {}]   ;;  %s606_s2 = inlined_call_operand.vmem [shape: f32[1,128], index: 2, kind: input, shape index: {}]   ;;  %s607_s3 = inlined_call_operand.hbm [shape: bf16[128,128], index: 3, kind: input, shape index: {}]   ;;  %s608_s4 = inlined_call_operand.vmem [shape: f32[1,128], index: 4, kind: input, shape index: {}]   ;;  %s609_s5 = inlined_call_operand.hbm [shape: bf16[128,256], index: 5, kind: input, shape index: {}]   ;;  %s610_s6 = inlined_call_operand.vmem [shape: f32[1,256], index: 6, kind: input, shape index: {}]   ;;  %s611_s7 = inlined_call_operand.vmem [shape: f32[16,256], index: 7, kind: output, shape index: {}]  }
   0x1   :  { %s24_s26 = sshll.u32 %s607_s3, 4  ;;  %s25_s26 = int_to_ptr.hbm [resolvable:$true] %s24_s26 }
   0x2   :  { %13 = vsyncpa [#allocation5], 0  ;;  %s519_s27 = smov [#allocation2]   ;;  %s39_s8 = sshll.u32 %s609_s5, 4  ;;  %s40_s8 = int_to_ptr.hbm [resolvable:$true] %s39_s8 }
   0x3   :  { %s26_s28 = sshll.u32 %s519_s27, 4  ;;  %s520_s9 = smov 64   ;;  %s27_s28 = int_to_ptr.vmem [resolvable:$true] %s26_s28 }
   0x4   :  { %s521_s10 = smov 4   ;;  %s522_s11 = smov [#allocation4]  }
   0x5   :  { %32 = dma.hbm_to_vmem [thread:$0]  %s25_s26, 1024, %s27_s28, [#allocation3], %s520_s9, %s520_s9, %s521_s10  }
   0x6   :  { %s41_s12 = sshll.u32 %s522_s11, 4  ;;  %s523_s13 = smov 128   ;;  %s42_s12 = int_to_ptr.vmem [resolvable:$true] %s41_s12 }
   0x7   :  { %s524_s14 = smov 8  }
   0x8   :  { %47 = dma.hbm_to_vmem [thread:$0]  %s40_s8, 2048, %s42_s12, [#allocation5], %s523_s13, %s523_s13, %s524_s14  }
   0x9   :  { %515 = dma.done.wait [#allocation3], 1024  }
   0xa   :  { %516 = vsyncadd [#allocation3], 4294966272 }
   0xb   :  { %517 = dma.done.wait [#allocation5], 2048  }
   0xc   :  { %518 = vsyncadd [#allocation5], 4294965248  ;;  %v434_v0 = vld [vmem:[%s605_s1 + $0x8] sm:$0xff]  ;;  %v433_v1 = vld [vmem:[%s605_s1] sm:$0xff]  ;;  %vm82_vm0 = vcmask 261120  }
   0xd   :  { %v442_v2 = vld [vmem:[#allocation2 + $0x38] sm:$0xff]  ;;  %92 = vmatpush.bf16.msra.mxu0 %v434_v0  ;;  %v59_v3 = vld [vmem:[%s604_s0] sm:$0xff]  ;;  %v60_v4 = vld [vmem:[%s604_s0 + $0x8] sm:$0xff] }
   0xe   :  { %171 = vmatpush.bf16.msra.mxu1 %v442_v2  ;;  %v441_v5 = vld [vmem:[#allocation2 + $0x30] sm:$0xff]  ;;  %v61_v6 = vpack.c.bf16 %v60_v4, %v59_v3  ;;  %v440_v7 = vld [vmem:[#allocation2 + $0x28] sm:$0xff]  ;;  %v439_v8 = vld [vmem:[#allocation2 + $0x20] sm:$0xff] }
   0xf   :  { %v438_v9 = vld [vmem:[#allocation2 + $0x18] sm:$0xff]  ;;  %v437_v10 = vld [vmem:[#allocation2 + $0x10] sm:$0xff]  ;;  %v436_v11 = vld [vmem:[#allocation2 + $0x8] sm:$0xff] }
  0x10   :  { %v435_v12 = vld [vmem:[#allocation2] sm:$0xff]  ;;  %v427_v13 = vld [vmem:[#allocation4 + $0x70] sm:$0xf]  ;;  %v458_v14 = vld [vmem:[#allocation4 + $0x74] sm:$0xf0] }
  0x11   :  { %93 = vmatpush.bf16.msra.mxu0 %v433_v1  ;;  %v457_v15 = vld [vmem:[#allocation4 + $0x74] sm:$0xf]  ;;  %v428_v16 = vor.u32 %v458_v14, %v427_v13  ;;  %v429_v17 = vld [vmem:[#allocation4 + $0x78] sm:$0xf0]  ;;  %v419_v18 = vld [vmem:[#allocation4 + $0x60] sm:$0xf] }
  0x12   :  { %172 = vmatpush.bf16.msra.mxu1 %v441_v5  ;;  %v456_v19 = vld [vmem:[#allocation4 + $0x64] sm:$0xf0]  ;;  %v432_v20 = vor.u32 %v457_v15, %v429_v17  ;;  %v455_v21 = vld [vmem:[#allocation4 + $0x64] sm:$0xf]  ;;  %v421_v22 = vld [vmem:[#allocation4 + $0x68] sm:$0xf0] }
  0x13   :  { %290 = vmatpush.bf16.msra.mxu2 %v428_v16  ;;  %v420_v23 = vor.u32 %v456_v19, %v419_v18  ;;  %v424_v24 = vor.u32 %v455_v21, %v421_v22  ;;  %v411_v25 = vld [vmem:[#allocation4 + $0x50] sm:$0xf]  ;;  %v454_v26 = vld [vmem:[#allocation4 + $0x54] sm:$0xf0]  ;;  %v453_v27 = vld [vmem:[#allocation4 + $0x54] sm:$0xf] }
  0x14   :  { %336 = vmatmul.msk.bf16.vlgmr.msra.gmra.mxu0 %vm82_vm0, %v61_v6  ;;  %304 = vmatpush.bf16.msra.mxu3 %v432_v20  ;;  %v413_v28 = vld [vmem:[#allocation4 + $0x58] sm:$0xf0]  ;;  %v412_v29 = vor.u32 %v454_v26, %v411_v25  ;;  %v403_v31 = vld [vmem:[#allocation4 + $0x40] sm:$0xf]  ;;  %v452_v32 = vld [vmem:[#allocation4 + $0x44] sm:$0xf0] }
  0x15   :  { %v416_v30 = vor.u32 %v453_v27, %v413_v28  ;;  %v451_v33 = vld [vmem:[#allocation4 + $0x44] sm:$0xf]  ;;  %v405_v34 = vld [vmem:[#allocation4 + $0x48] sm:$0xf0]  ;;  %v404_v35 = vor.u32 %v452_v32, %v403_v31  ;;  %v465_v38 = vld [vmem:[%s606_s2] ss:$0 sm:$0xff] }
  0x16   :  { %173 = vmatpush.bf16.msra.mxu1 %v440_v7  ;;  %v408_v36 = vor.u32 %v451_v33, %v405_v34  ;;  %v395_v45 = vld [vmem:[#allocation4 + $0x30] sm:$0xf]  ;;  %v450_v46 = vld [vmem:[#allocation4 + $0x34] sm:$0xf0]  ;;  %v449_v47 = vld [vmem:[#allocation4 + $0x34] sm:$0xf] }
  0x17   :  { %291 = vmatpush.bf16.msra.mxu2 %v420_v23  ;;  %v396_v48 = vor.u32 %v450_v46, %v395_v45  ;;  %v397_v49 = vld [vmem:[#allocation4 + $0x38] sm:$0xf0]  ;;  %v387_v51 = vld [vmem:[#allocation4 + $0x20] sm:$0xf]  ;;  %v448_v52 = vld [vmem:[#allocation4 + $0x24] sm:$0xf0] }
  0x18   :  { %305 = vmatpush.bf16.msra.mxu3 %v424_v24  ;;  %v400_v50 = vor.u32 %v449_v47, %v397_v49  ;;  %v447_v53 = vld [vmem:[#allocation4 + $0x24] sm:$0xf]  ;;  %v388_v54 = vor.u32 %v448_v52, %v387_v51  ;;  %v389_v55 = vld [vmem:[#allocation4 + $0x28] sm:$0xf0]  ;;  %v379_v57 = vld [vmem:[#allocation4 + $0x10] sm:$0xf] }
  0x19   :  { %v392_v56 = vor.u32 %v447_v53, %v389_v55  ;;  %v446_v58 = vld [vmem:[#allocation4 + $0x14] sm:$0xf0]  ;;  %v445_v59 = vld [vmem:[#allocation4 + $0x14] sm:$0xf]  ;;  %v381_v61 = vld [vmem:[#allocation4 + $0x18] sm:$0xf0] }
  0x1a   :  { %174 = vmatpush.bf16.msra.mxu1 %v439_v8  ;;  %v380_v60 = vor.u32 %v446_v58, %v379_v57  ;;  %v384_v62 = vor.u32 %v445_v59, %v381_v61  ;;  %v371_v63 = vld [vmem:[#allocation4] sm:$0xf]  ;;  %v444_v0 = vld [vmem:[#allocation4 + $0x4] sm:$0xf0]  ;;  %v443_v1 = vld [vmem:[#allocation4 + $0x4] sm:$0xf] }
  0x1b   :  { %292 = vmatpush.bf16.msra.mxu2 %v412_v29  ;;  %v372_v2 = vor.u32 %v444_v0, %v371_v63  ;;  %v373_v3 = vld [vmem:[#allocation4 + $0x8] sm:$0xf0]  ;;  %v466_v6 = vld [vmem:[%s608_s4] ss:$0 sm:$0xff] }
  0x1c   :  { %306 = vmatpush.bf16.msra.mxu3 %v416_v30  ;;  %v376_v4 = vor.u32 %v443_v1, %v373_v3  ;;  %v204_v13 = vld [vmem:[%s610_s6] sm:$0x3] }
  0x1d   :  { %v206_v14 = vperm.slane %v204_v13, 0  ;;  %v207_v15 = vperm.slane %v204_v13, 1 }
  0x1e   :  { %175 = vmatpush.bf16.msra.mxu1 %v438_v9 }
  0x1f   :  { %293 = vmatpush.bf16.msra.mxu2 %v404_v35 }
  0x20   :  { %307 = vmatpush.bf16.msra.mxu3 %v408_v36 }
  0x22   :  { %176 = vmatpush.bf16.msra.mxu1 %v437_v10 }
  0x23   :  { %294 = vmatpush.bf16.msra.mxu2 %v396_v48 }
  0x24   :  { %308 = vmatpush.bf16.msra.mxu3 %v400_v50 }
  0x26   :  { %177 = vmatpush.bf16.msra.mxu1 %v436_v11 }
  0x27   :  { %295 = vmatpush.bf16.msra.mxu2 %v388_v54 }
  0x28   :  { %309 = vmatpush.bf16.msra.mxu3 %v392_v56 }
  0x2a   :  { %178 = vmatpush.bf16.msra.mxu1 %v435_v12 }
  0x2b   :  { %296 = vmatpush.bf16.msra.mxu2 %v380_v60 }
  0x2c   :  { %310 = vmatpush.bf16.msra.mxu3 %v384_v62 }
  0x2f   :  { %297 = vmatpush.bf16.msra.mxu2 %v372_v2 }
  0x30   :  { %311 = vmatpush.bf16.msra.mxu3 %v376_v4 }
  0x91   :  { %v95_v37 = vpop.f32.mrf.mxu0 }
  0x92   :  { %v96_v39 = vadd.f32 %v465_v38, %v95_v37 }
  0x94   :  { %v100_v42 = vmax.f32 %v96_v39, 0.0 }
  0x99   :  { %v97_v40 = vpop.f32.mrf.mxu0 }
  0x9a   :  { %v98_v41 = vadd.f32 %v465_v38, %v97_v40 }
  0x9c   :  { %v101_v43 = vmax.f32 %v98_v41, 0.0 }
  0x9e   :  { %v102_v44 = vpack.c.bf16 %v101_v43, %v100_v42 }
  0xa0   :  { %179 = vmatmul.bf16.vlgmr.msra.gmra.mxu1 %v102_v44 }
 0x11d   :  { %v180_v5 = vpop.f32.mrf.mxu1 }
 0x11e   :  { %v181_v7 = vadd.f32 %v466_v6, %v180_v5 }
 0x120   :  { %v185_v10 = vmax.f32 %v181_v7, 0.0 }
 0x125   :  { %v182_v8 = vpop.f32.mrf.mxu1 }
 0x126   :  { %v183_v9 = vadd.f32 %v466_v6, %v182_v8 }
 0x128   :  { %v186_v11 = vmax.f32 %v183_v9, 0.0 }
 0x12a   :  { %v187_v12 = vpack.c.bf16 %v186_v11, %v185_v10 }
 0x12c   :  { %298 = vmatmul.bf16.vlgmr.msra.gmra.mxu2 %v187_v12  ;;  %312 = vmatmul.bf16.vlgmr.msra.gmra.mxu3 %v187_v12 }
 0x1af   :  { %v299_v16 = vpop.f32.mrf.mxu2  ;;  %v313_v17 = vpop.f32.mrf.mxu3 }
 0x1b0   :  { %v300_v18 = vadd.f32 %v299_v16, %v206_v14  ;;  %v314_v19 = vadd.f32 %v313_v17, %v207_v15 }
 0x1b2   :  { %318 = vst [vmem:[%s611_s7] sm:$0xff] %v300_v18 }
 0x1b3   :  { %319 = vst [vmem:[%s611_s7 + $0x8] sm:$0xff] %v314_v19 }
 0x1b7   :  { %v301_v20 = vpop.f32.mrf.mxu2  ;;  %v315_v21 = vpop.f32.mrf.mxu3 }
 0x1b8   :  { %v302_v22 = vadd.f32 %v301_v20, %v206_v14  ;;  %v316_v23 = vadd.f32 %v315_v21, %v207_v15 }
 0x1ba   :  { %320 = vst [vmem:[%s611_s7 + $0x10] sm:$0xff] %v302_v22 }
 0x1bb   :  { %321 = vst [vmem:[%s611_s7 + $0x18] sm:$0xff] %v316_v23 }
 0x1bc   :  { %326 = vsyncpa [#allocation3], 1 }
 0x1bd   :  { %327 = vsyncpa [#allocation5], 1 }

</bundles_post_ra>
